<compile_context>
chip_gen: v6e
topology: v6e:2x2x1
jax: 0.10.0
libtpu: 0.0.40
codegen_flags: <defaults>
</compile_context>

<pallas_src>
import functools

import jax
import jax.numpy as jnp
from jax import lax
from jax.experimental import pallas as pl
from jax.experimental.pallas import tpu as pltpu


def _roll(x, shift, axis):
    """pltpu.roll with the shift canonicalised to a non-negative static amount."""
    n = x.shape[axis]
    return pltpu.roll(x, shift % n, axis)


def dwconv_kernel(top_ref, x_ref, bot_ref, w_ref, b_ref, o_ref, *, C):
    # top_ref: (1, 1, 1, WC)  row just above this tile (clamped at the border)
    # x_ref:   (1, TH, WC)    current row tile, folded layout (WC = W*C)
    # bot_ref: (1, 1, 1, WC)  row just below this tile (clamped at the border)
    # w_ref:   (9, WC)  f32   per-tap depthwise weights, tiled along W, with the
    #                         left/right image-border columns already zeroed
    # b_ref:   (1, WC)  f32   bias, tiled along W
    # o_ref:   (1, TH, WC)
    t = pl.program_id(1)
    nt = pl.num_programs(1)
    TH = o_ref.shape[1]
    WC = o_ref.shape[2]

    x = x_ref[...].astype(jnp.float32)                                # (1, TH, WC)

    # Halo rows; zeroed when they fall outside the image (true zero padding).
    top_valid = (t > 0).astype(jnp.float32)
    bot_valid = (t < nt - 1).astype(jnp.float32)
    top = top_ref[...].reshape(1, 1, WC).astype(jnp.float32) * top_valid
    bot = bot_ref[...].reshape(1, 1, WC).astype(jnp.float32) * bot_valid

    # Vertical neighbours: sublane roll + boundary-row patch.
    row = lax.broadcasted_iota(jnp.int32, (1, TH, 1), 1)
    up = jnp.where(row == 0, top, _roll(x, 1, axis=1))                # x[h-1, :]
    down = jnp.where(row == TH - 1, bot, _roll(x, -1, axis=1))        # x[h+1, :]

    # 3x3 taps, tap k = 3*kh + kw.  Horizontal border handling is baked into
    # the pre-masked weights, so no lane iota / selects here.  Accumulate
    # tap-by-tap to keep the rolled-copy live ranges short.
    acc = b_ref[...] + x * w_ref[4]            # centre
    acc = acc + up * w_ref[1]                  # (h-1, w)
    acc = acc + down * w_ref[7]                # (h+1, w)
    acc = acc + _roll(up, C, 2) * w_ref[0]     # (h-1, w-1)
    acc = acc + _roll(x, C, 2) * w_ref[3]      # (h,   w-1)
    acc = acc + _roll(down, C, 2) * w_ref[6]   # (h+1, w-1)
    acc = acc + _roll(up, -C, 2) * w_ref[2]    # (h-1, w+1)
    acc = acc + _roll(x, -C, 2) * w_ref[5]     # (h,   w+1)
    acc = acc + _roll(down, -C, 2) * w_ref[8]  # (h+1, w+1)

    o_ref[...] = acc.astype(o_ref.dtype)


def _vmem_capacity_bytes():
    try:
        return int(pltpu.get_tpu_info().vmem_capacity_bytes)
    except Exception:
        return 128 * 1024 * 1024


def _pick_tile_h(H, WC, itemsize=4):
    """Largest row tile that divides H, keeps the sublane dim aligned and keeps
    an f32 tile slab under a generation-aware target (bigger tiles amortise the
    ~0.35us per-step overhead and the 2/TH halo re-read; v7x's 64 MiB VMEM
    cannot absorb the same tile-sized f32 temporaries that 128-MiB parts can)."""
    vmem = _vmem_capacity_bytes()
    target_bytes = (3 << 20) if vmem >= (100 << 20) else (1 << 20)
    max_rows = max(1, target_bytes // (WC * 4))
    step = 16 if itemsize < 4 else 8   # packed sublane stores for 16-bit output
    cands = [d for d in range(step, H + 1, step) if H % d == 0]
    cands.append(H)
    ok = [d for d in cands if d <= max_rows]
    return max(ok) if ok else min(cands)


def dwconv_pallas(x, H, W, weight, bias, tile_h=None):
    """x: (B, N, C) with N == H*W; weight: (C, 1, 3, 3) (PyTorch layout); bias: (C,).
    HBM I/O stays in x.dtype (bf16 recommended on bandwidth-bound parts);
    compute / accumulation is f32."""
    B, N, C = x.shape
    assert N == H * W
    WC = W * C
    # NOTE: WC should be a multiple of 128 so the output block is lane-dense
    # (unmasked vst); true for the FeedFormer decode-head shapes.

    # Folded, lane-dense layout; both reshapes are metadata-only.
    x_img = x.reshape(B, H, WC)
    x_rows = x_img.reshape(B, H, 1, WC)   # per-row view for the halo fetches

    # Weights (C,1,3,3) -> (3,3,C) -> (9,C) -> tiled along W -> (9, W*C), f32.
    w_hwc = jnp.transpose(weight[:, 0, :, :], (1, 2, 0)).reshape(9, C)
    w_folded = jnp.tile(w_hwc, (1, W)).astype(jnp.float32)           # (9, WC)
    # Fold the horizontal zero-padding into the weights: left-neighbour taps
    # (kw=0 -> 0,3,6) contribute nothing to output column 0 (first C lanes),
    # right-neighbour taps (kw=2 -> 2,5,8) nothing to column W-1 (last C lanes).
    lane = jnp.arange(WC)
    left_tap = (jnp.arange(9) % 3 == 0)[:, None]    # taps 0, 3, 6
    right_tap = (jnp.arange(9) % 3 == 2)[:, None]   # taps 2, 5, 8
    border_mask = jnp.where(left_tap & (lane[None, :] < C), 0.0, 1.0)
    border_mask = border_mask * jnp.where(
        right_tap & (lane[None, :] >= WC - C), 0.0, 1.0)
    w_folded = w_folded * border_mask.astype(jnp.float32)
    b_folded = jnp.tile(bias.reshape(1, C), (1, W)).astype(jnp.float32)  # (1, WC)

    if tile_h is None:
        tile_h = _pick_tile_h(H, WC, itemsize=jnp.dtype(x.dtype).itemsize)
    assert H % tile_h == 0
    assert tile_h % 8 == 0 or tile_h == H
    nt = H // tile_h

    vmem_cap = _vmem_capacity_bytes()
    vmem_limit = min(vmem_cap // 2, 64 * 1024 * 1024)

    kernel = functools.partial(dwconv_kernel, C=C)

    # TODO(synk): on v7x consider pltpu.CORE_PARALLEL on a leading axis so the
    # grid provably shards across both TensorCores; plain "parallel" kept here
    # for portability across v5e/v6e/v7x.
    out = pl.pallas_call(
        kernel,
        out_shape=jax.ShapeDtypeStruct((B, H, WC), x.dtype),
        grid=(B, nt),
        in_specs=[
            # row above the tile (block size 1 on H => block index == row index)
            pl.BlockSpec((1, 1, 1, WC),
                         lambda b, t: (b, jnp.maximum(t * tile_h - 1, 0), 0, 0)),
            # the row tile itself
            pl.BlockSpec((1, tile_h, WC), lambda b, t: (b, t, 0)),
            # row below the tile
            pl.BlockSpec((1, 1, 1, WC),
                         lambda b, t: (b, jnp.minimum(t * tile_h + tile_h, H - 1), 0, 0)),
            # weights / bias: constant block index -> fetched once, not per step
            pl.BlockSpec((9, WC), lambda b, t: (0, 0)),
            pl.BlockSpec((1, WC), lambda b, t: (0, 0)),
        ],
        out_specs=pl.BlockSpec((1, tile_h, WC), lambda b, t: (b, t, 0)),
        compiler_params=pltpu.CompilerParams(
            dimension_semantics=("parallel", "parallel"),
            vmem_limit_bytes=vmem_limit,
        ),
    )(x_rows, x_img, x_rows, w_folded, b_folded)

    return out.reshape(B, N, C)


def dwconv_reference(x, H, W, weight, bias):
    """Pure-JAX f32 reference matching PyTorch nn.Conv2d(dim, dim, 3, 1, 1, groups=dim)."""
    B, N, C = x.shape
    x_nchw = jnp.transpose(x.astype(jnp.float32), (0, 2, 1)).reshape(B, C, H, W)
    out = lax.conv_general_dilated(
        x_nchw, weight.astype(jnp.float32),
        window_strides=(1, 1),
        padding=((1, 1), (1, 1)),
        dimension_numbers=("NCHW", "OIHW", "NCHW"),
        feature_group_count=C,
    ) + bias.reshape(1, C, 1, 1).astype(jnp.float32)
    return jnp.transpose(out.reshape(B, C, H * W), (0, 2, 1))


def _run_case(key, B, H, W, C, tile_h, dtype=jnp.float32, atol=1e-5, rtol=1e-5):
    N = H * W
    kx, kw, kb = jax.random.split(key, 3)
    x = jax.random.normal(kx, (B, N, C), dtype=jnp.float32).astype(dtype)
    # nn.Conv2d(dim, dim, 3, groups=dim): weight (dim,1,3,3), bias (dim,)
    fan_in = 1 * 3 * 3
    bound = 1.0 / (fan_in ** 0.5)
    weight = jax.random.uniform(kw, (C, 1, 3, 3), jnp.float32, -bound, bound)
    bias = jax.random.uniform(kb, (C,), jnp.float32, -bound, bound)

    out = dwconv_pallas(x, H, W, weight, bias, tile_h=tile_h)
    out = jax.block_until_ready(out)

    ref = dwconv_reference(x, H, W, weight, bias)
    assert out.shape == (B, N, C)
    assert out.dtype == dtype
    assert jnp.allclose(out.astype(jnp.float32), ref, atol=atol, rtol=rtol)


if __name__ == "__main__":
    key = jax.random.PRNGKey(0)
    k1, k2, k3 = jax.random.split(key, 3)

    # Multi-tile f32 case: exercises interior + top/bottom boundary tiles.
    _run_case(k1, B=2, H=16, W=16, C=32, tile_h=8)
    # Single-tile f32 case: both halo rows clamped & zeroed, auto tile pick.
    _run_case(k2, B=2, H=8, W=8, C=16, tile_h=None)
    # bf16 I/O case (HBM bytes halved; f32 compute): multi-tile, auto pick.
    _run_case(k3, B=1, H=32, W=8, C=16, tile_h=None,
              dtype=jnp.bfloat16, atol=2e-2, rtol=2e-2)

    print("KERNEL_OK")
</pallas_src>

<mosaic_0001>
module attributes {stable_mosaic.version = 11 : i64} {
  func.func @dwconv_kernel(%arg0: i32, %arg1: i32, %arg2: memref<1x1x1x512xf32, #tpu.memory_space<vmem>>, %arg3: memref<1x8x512xf32, #tpu.memory_space<vmem>>, %arg4: memref<1x1x1x512xf32, #tpu.memory_space<vmem>>, %arg5: memref<9x512xf32, #tpu.memory_space<vmem>>, %arg6: memref<1x512xf32, #tpu.memory_space<vmem>>, %arg7: memref<1x8x512xf32, #tpu.memory_space<vmem>>) attributes {dimension_semantics = [#tpu.dimension_semantics<parallel>, #tpu.dimension_semantics<parallel>], iteration_bounds = array<i64: 2, 2>, scalar_prefetch = 0 : i64, scratch_operands = 0 : i64, tpu.core_type = #tpu.core_type<tc>, window_params = [{transform_indices = @transform_0, window_bounds = array<i64: 1, 1, 1, 512>}, {transform_indices = @transform_1, window_bounds = array<i64: 1, 8, 512>}, {transform_indices = @transform_2, window_bounds = array<i64: 1, 1, 1, 512>}, {pipeline_mode = #tpu.pipeline_mode<synchronous>, transform_indices = @transform_3, window_bounds = array<i64: 9, 512>}, {pipeline_mode = #tpu.pipeline_mode<synchronous>, transform_indices = @transform_4, window_bounds = array<i64: 1, 512>}, {transform_indices = @transform_5, window_bounds = array<i64: 1, 8, 512>}]} {
    %c0 = arith.constant 0 : index
    %c0_0 = arith.constant 0 : index
    %c0_1 = arith.constant 0 : index
    %0 = vector.load %arg3[%c0, %c0_0, %c0_1] : memref<1x8x512xf32, #tpu.memory_space<vmem>>, vector<1x8x512xf32>
    %c0_i32 = arith.constant 0 : i32
    %1 = arith.cmpi sgt, %arg1, %c0_i32 : i32
    %2 = arith.extui %1 : i1 to i32
    %3 = arith.sitofp %2 : i32 to f32
    %c1_i32 = arith.constant 1 : i32
    %4 = arith.cmpi slt, %arg1, %c1_i32 : i32
    %5 = arith.extui %4 : i1 to i32
    %6 = arith.sitofp %5 : i32 to f32
    %c0_2 = arith.constant 0 : index
    %c0_3 = arith.constant 0 : index
    %c0_4 = arith.constant 0 : index
    %c0_5 = arith.constant 0 : index
    %7 = vector.load %arg2[%c0_2, %c0_3, %c0_4, %c0_5] : memref<1x1x1x512xf32, #tpu.memory_space<vmem>>, vector<1x1x1x512xf32>
    %8 = vector.shape_cast %7 : vector<1x1x1x512xf32> to vector<1x1x512xf32>
    %9 = vector.broadcast %3 : f32 to vector<1x1x512xf32>
    %10 = arith.mulf %8, %9 : vector<1x1x512xf32>
    %c0_6 = arith.constant 0 : index
    %c0_7 = arith.constant 0 : index
    %c0_8 = arith.constant 0 : index
    %c0_9 = arith.constant 0 : index
    %11 = vector.load %arg4[%c0_6, %c0_7, %c0_8, %c0_9] : memref<1x1x1x512xf32, #tpu.memory_space<vmem>>, vector<1x1x1x512xf32>
    %12 = vector.shape_cast %11 : vector<1x1x1x512xf32> to vector<1x1x512xf32>
    %13 = vector.broadcast %6 : f32 to vector<1x1x512xf32>
    %14 = arith.mulf %12, %13 : vector<1x1x512xf32>
    %15 = tpu.iota {dimensions = array<i32: 1>} : vector<1x8x1xi32>
    %c0_i32_10 = arith.constant 0 : i32
    %16 = vector.broadcast %c0_i32_10 : i32 to vector<1x8x1xi32>
    %17 = arith.cmpi eq, %15, %16 : vector<1x8x1xi32>
    %c1_i32_11 = arith.constant 1 : i32
    %18 = tpu.dynamic_rotate %0 by %c1_i32_11 dim 1 : vector<1x8x512xf32>, i32 -> vector<1x8x512xf32>
    %19 = vector.shape_cast %17 : vector<1x8x1xi1> to vector<1x8x1xi1>
    %20 = vector.broadcast %19 : vector<1x8x1xi1> to vector<1x8x512xi1>
    %21 = vector.shape_cast %10 : vector<1x1x512xf32> to vector<1x1x512xf32>
    %22 = vector.broadcast %21 : vector<1x1x512xf32> to vector<1x8x512xf32>
    %23 = arith.select %20, %22, %18 : vector<1x8x512xi1>, vector<1x8x512xf32>
    %c7_i32 = arith.constant 7 : i32
    %24 = vector.broadcast %c7_i32 : i32 to vector<1x8x1xi32>
    %25 = arith.cmpi eq, %15, %24 : vector<1x8x1xi32>
    %c7_i32_12 = arith.constant 7 : i32
    %26 = tpu.dynamic_rotate %0 by %c7_i32_12 dim 1 : vector<1x8x512xf32>, i32 -> vector<1x8x512xf32>
    %27 = vector.shape_cast %25 : vector<1x8x1xi1> to vector<1x8x1xi1>
    %28 = vector.broadcast %27 : vector<1x8x1xi1> to vector<1x8x512xi1>
    %29 = vector.shape_cast %14 : vector<1x1x512xf32> to vector<1x1x512xf32>
    %30 = vector.broadcast %29 : vector<1x1x512xf32> to vector<1x8x512xf32>
    %31 = arith.select %28, %30, %26 : vector<1x8x512xi1>, vector<1x8x512xf32>
    %c0_13 = arith.constant 0 : index
    %c0_14 = arith.constant 0 : index
    %32 = vector.load %arg6[%c0_13, %c0_14] : memref<1x512xf32, #tpu.memory_space<vmem>>, vector<1x512xf32>
    %c4 = arith.constant 4 : index
    %c0_15 = arith.constant 0 : index
    %33 = vector.load %arg5[%c4, %c0_15] : memref<9x512xf32, #tpu.memory_space<vmem>>, vector<1x512xf32>
    %34 = vector.shape_cast %33 : vector<1x512xf32> to vector<512xf32>
    %35 = vector.shape_cast %34 : vector<512xf32> to vector<1x1x512xf32>
    %36 = vector.broadcast %35 : vector<1x1x512xf32> to vector<1x8x512xf32>
    %37 = arith.mulf %0, %36 : vector<1x8x512xf32>
    %38 = vector.shape_cast %32 : vector<1x512xf32> to vector<1x1x512xf32>
    %39 = vector.broadcast %38 : vector<1x1x512xf32> to vector<1x8x512xf32>
    %40 = arith.addf %39, %37 : vector<1x8x512xf32>
    %c1 = arith.constant 1 : index
    %c0_16 = arith.constant 0 : index
    %41 = vector.load %arg5[%c1, %c0_16] : memref<9x512xf32, #tpu.memory_space<vmem>>, vector<1x512xf32>
    %42 = vector.shape_cast %41 : vector<1x512xf32> to vector<512xf32>
    %43 = vector.shape_cast %42 : vector<512xf32> to vector<1x1x512xf32>
    %44 = vector.broadcast %43 : vector<1x1x512xf32> to vector<1x8x512xf32>
    %45 = arith.mulf %23, %44 : vector<1x8x512xf32>
    %46 = arith.addf %40, %45 : vector<1x8x512xf32>
    %c7 = arith.constant 7 : index
    %c0_17 = arith.constant 0 : index
    %47 = vector.load %arg5[%c7, %c0_17] : memref<9x512xf32, #tpu.memory_space<vmem>>, vector<1x512xf32>
    %48 = vector.shape_cast %47 : vector<1x512xf32> to vector<512xf32>
    %49 = vector.shape_cast %48 : vector<512xf32> to vector<1x1x512xf32>
    %50 = vector.broadcast %49 : vector<1x1x512xf32> to vector<1x8x512xf32>
    %51 = arith.mulf %31, %50 : vector<1x8x512xf32>
    %52 = arith.addf %46, %51 : vector<1x8x512xf32>
    %c32_i32 = arith.constant 32 : i32
    %53 = tpu.dynamic_rotate %23 by %c32_i32 dim 2 : vector<1x8x512xf32>, i32 -> vector<1x8x512xf32>
    %c0_18 = arith.constant 0 : index
    %c0_19 = arith.constant 0 : index
    %54 = vector.load %arg5[%c0_18, %c0_19] : memref<9x512xf32, #tpu.memory_space<vmem>>, vector<1x512xf32>
    %55 = vector.shape_cast %54 : vector<1x512xf32> to vector<512xf32>
    %56 = vector.shape_cast %55 : vector<512xf32> to vector<1x1x512xf32>
    %57 = vector.broadcast %56 : vector<1x1x512xf32> to vector<1x8x512xf32>
    %58 = arith.mulf %53, %57 : vector<1x8x512xf32>
    %59 = arith.addf %52, %58 : vector<1x8x512xf32>
    %c32_i32_20 = arith.constant 32 : i32
    %60 = tpu.dynamic_rotate %0 by %c32_i32_20 dim 2 : vector<1x8x512xf32>, i32 -> vector<1x8x512xf32>
    %c3 = arith.constant 3 : index
    %c0_21 = arith.constant 0 : index
    %61 = vector.load %arg5[%c3, %c0_21] : memref<9x512xf32, #tpu.memory_space<vmem>>, vector<1x512xf32>
    %62 = vector.shape_cast %61 : vector<1x512xf32> to vector<512xf32>
    %63 = vector.shape_cast %62 : vector<512xf32> to vector<1x1x512xf32>
    %64 = vector.broadcast %63 : vector<1x1x512xf32> to vector<1x8x512xf32>
    %65 = arith.mulf %60, %64 : vector<1x8x512xf32>
    %66 = arith.addf %59, %65 : vector<1x8x512xf32>
    %c32_i32_22 = arith.constant 32 : i32
    %67 = tpu.dynamic_rotate %31 by %c32_i32_22 dim 2 : vector<1x8x512xf32>, i32 -> vector<1x8x512xf32>
    %c6 = arith.constant 6 : index
    %c0_23 = arith.constant 0 : index
    %68 = vector.load %arg5[%c6, %c0_23] : memref<9x512xf32, #tpu.memory_space<vmem>>, vector<1x512xf32>
    %69 = vector.shape_cast %68 : vector<1x512xf32> to vector<512xf32>
    %70 = vector.shape_cast %69 : vector<512xf32> to vector<1x1x512xf32>
    %71 = vector.broadcast %70 : vector<1x1x512xf32> to vector<1x8x512xf32>
    %72 = arith.mulf %67, %71 : vector<1x8x512xf32>
    %73 = arith.addf %66, %72 : vector<1x8x512xf32>
    %c480_i32 = arith.constant 480 : i32
    %74 = tpu.dynamic_rotate %23 by %c480_i32 dim 2 : vector<1x8x512xf32>, i32 -> vector<1x8x512xf32>
    %c2 = arith.constant 2 : index
    %c0_24 = arith.constant 0 : index
    %75 = vector.load %arg5[%c2, %c0_24] : memref<9x512xf32, #tpu.memory_space<vmem>>, vector<1x512xf32>
    %76 = vector.shape_cast %75 : vector<1x512xf32> to vector<512xf32>
    %77 = vector.shape_cast %76 : vector<512xf32> to vector<1x1x512xf32>
    %78 = vector.broadcast %77 : vector<1x1x512xf32> to vector<1x8x512xf32>
    %79 = arith.mulf %74, %78 : vector<1x8x512xf32>
    %80 = arith.addf %73, %79 : vector<1x8x512xf32>
    %c480_i32_25 = arith.constant 480 : i32
    %81 = tpu.dynamic_rotate %0 by %c480_i32_25 dim 2 : vector<1x8x512xf32>, i32 -> vector<1x8x512xf32>
    %c5 = arith.constant 5 : index
    %c0_26 = arith.constant 0 : index
    %82 = vector.load %arg5[%c5, %c0_26] : memref<9x512xf32, #tpu.memory_space<vmem>>, vector<1x512xf32>
    %83 = vector.shape_cast %82 : vector<1x512xf32> to vector<512xf32>
    %84 = vector.shape_cast %83 : vector<512xf32> to vector<1x1x512xf32>
    %85 = vector.broadcast %84 : vector<1x1x512xf32> to vector<1x8x512xf32>
    %86 = arith.mulf %81, %85 : vector<1x8x512xf32>
    %87 = arith.addf %80, %86 : vector<1x8x512xf32>
    %c480_i32_27 = arith.constant 480 : i32
    %88 = tpu.dynamic_rotate %31 by %c480_i32_27 dim 2 : vector<1x8x512xf32>, i32 -> vector<1x8x512xf32>
    %c8 = arith.constant 8 : index
    %c0_28 = arith.constant 0 : index
    %89 = vector.load %arg5[%c8, %c0_28] : memref<9x512xf32, #tpu.memory_space<vmem>>, vector<1x512xf32>
    %90 = vector.shape_cast %89 : vector<1x512xf32> to vector<512xf32>
    %91 = vector.shape_cast %90 : vector<512xf32> to vector<1x1x512xf32>
    %92 = vector.broadcast %91 : vector<1x1x512xf32> to vector<1x8x512xf32>
    %93 = arith.mulf %88, %92 : vector<1x8x512xf32>
    %94 = arith.addf %87, %93 : vector<1x8x512xf32>
    %c0_29 = arith.constant 0 : index
    %c0_30 = arith.constant 0 : index
    %c0_31 = arith.constant 0 : index
    %95 = vector.load %arg7[%c0_29, %c0_30, %c0_31] : memref<1x8x512xf32, #tpu.memory_space<vmem>>, vector<1x8x512xf32>
    tpu.vector_store %arg7[%c0_29, %c0_30, %c0_31], %94 {strides = array<i32>} : memref<1x8x512xf32, #tpu.memory_space<vmem>>, vector<1x8x512xf32>,
    return
  }
  func.func @transform_0(%arg0: i32, %arg1: i32) -> (i32, i32, i32, i32) {
    %c8_i32 = arith.constant 8 : i32
    %0 = arith.muli %arg1, %c8_i32 : i32
    %c1_i32 = arith.constant 1 : i32
    %1 = arith.subi %0, %c1_i32 : i32
    %c0_i32 = arith.constant 0 : i32
    %2 = arith.maxsi %1, %c0_i32 : i32
    %c0_i32_0 = arith.constant 0 : i32
    %c0_i32_1 = arith.constant 0 : i32
    %c0_i32_2 = arith.constant 0 : i32
    return %arg0, %2, %c0_i32_0, %c0_i32_1 : i32, i32, i32, i32
  }
  func.func @transform_1(%arg0: i32, %arg1: i32) -> (i32, i32, i32) {
    %c0_i32 = arith.constant 0 : i32
    %c0_i32_0 = arith.constant 0 : i32
    return %arg0, %arg1, %c0_i32 : i32, i32, i32
  }
  func.func @transform_2(%arg0: i32, %arg1: i32) -> (i32, i32, i32, i32) {
    %c8_i32 = arith.constant 8 : i32
    %0 = arith.muli %arg1, %c8_i32 : i32
    %c8_i32_0 = arith.constant 8 : i32
    %1 = arith.addi %0, %c8_i32_0 : i32
    %c15_i32 = arith.constant 15 : i32
    %2 = arith.minsi %1, %c15_i32 : i32
    %c0_i32 = arith.constant 0 : i32
    %c0_i32_1 = arith.constant 0 : i32
    %c0_i32_2 = arith.constant 0 : i32
    return %arg0, %2, %c0_i32, %c0_i32_1 : i32, i32, i32, i32
  }
  func.func @transform_3(%arg0: i32, %arg1: i32) -> (i32, i32) {
    %c0_i32 = arith.constant 0 : i32
    %c0_i32_0 = arith.constant 0 : i32
    %c0_i32_1 = arith.constant 0 : i32
    return %c0_i32, %c0_i32_0 : i32, i32
  }
  func.func @transform_4(%arg0: i32, %arg1: i32) -> (i32, i32) {
    %c0_i32 = arith.constant 0 : i32
    %c0_i32_0 = arith.constant 0 : i32
    %c0_i32_1 = arith.constant 0 : i32
    return %c0_i32, %c0_i32_0 : i32, i32
  }
  func.func @transform_5(%arg0: i32, %arg1: i32) -> (i32, i32, i32) {
    %c0_i32 = arith.constant 0 : i32
    %c0_i32_0 = arith.constant 0 : i32
    return %arg0, %arg1, %c0_i32 : i32, i32, i32
  }
}

</mosaic_0001>

<bundles_post_ra>
// kernel: tpu_custom_call.1
= control target key start
LH: loop header
LB: loop body
LE: loop exit
PB: predicated region body
PF: predicated region fallthrough
CT: control target
= control target key end

     0   :  { %s2077_s0 = inlined_call_operand.hbm [shape: f32[2,16,1,512], index: 0, kind: input, shape index: {}]   ;;  %s2078_s1 = inlined_call_operand.hbm [shape: f32[2,16,512], index: 1, kind: input, shape index: {}]   ;;  %s2079_s2 = inlined_call_operand.hbm [shape: f32[2,16,1,512], index: 2, kind: input, shape index: {}]   ;;  %s2080_s3 = inlined_call_operand.hbm [shape: f32[9,512], index: 3, kind: input, shape index: {}]   ;;  %s2081_s4 = inlined_call_operand.vmem [shape: f32[1,512], index: 4, kind: input, shape index: {}]   ;;  %s2082_s5 = inlined_call_operand.hbm [shape: f32[2,16,512], index: 5, kind: output, shape index: {}]  }
   0x1   :  { %2101 = sst [smem:[#allocation29_spill]] %s2078_s1 }
   0x2   :  { %2102 = sst [smem:[#allocation30_spill]] %s2079_s2 }
   0x3   :  { %2103 = sst [smem:[#allocation31_spill]] %s2080_s3 }
   0x4   :  { %2104 = sst [smem:[#allocation32_spill]] %s2081_s4 }
   0x5   :  { %2105 = sst [smem:[#allocation33_spill]] %s2082_s5 }
   0x6   :  { %10 = vsyncpa [#allocation3], 0 }
   0x7   :  { %12 = vsyncpa [#allocation3 + $0x1], 0 }
   0x8   :  { %13 = vsyncpa [#allocation6], 0 }
   0x9   :  { %15 = vsyncpa [#allocation6 + $0x1], 0 }
   0xa   :  { %16 = vsyncpa [#allocation9], 0 }
   0xb   :  { %17 = vsyncpa [#allocation4], 0 }
   0xc   :  { %19 = vsyncpa [#allocation4 + $0x1], 0  ;;  %s1508_s18 = smov 0   ;;  %s1510_s19 = smov 0  }
   0xd   :  { %s1512_s20 = smov 0   ;;  %s1514_s21 = smov 0  }
   0xe   :  { %s1516_s22 = smov 0   ;;  %s1518_s23 = smov 0  }
   0xf   :  { %s1520_s24 = smov 0   ;;  %s1522_s25 = smov 0  }
  0x10   :  { %s1524_s26 = smov 0   ;;  %s1526_s27 = smov 0  }
  0x11   :  { %s1528_s28 = smov 0   ;;  %s1530_s29 = smov 0  }
  0x12   :  { %s1532_s30 = smov 0   ;;  %s1534_s6 = smov 0  }
  0x13 LB: > { %2106 = sst [smem:[#allocation16_spill]] %s1427_s21  ;;  %s1579_s7 = sadd.s32 4294967295, %s1467_s6   ;;  %s1467_s6 = sphi %s1534_s6, %s25_s6   ;;  %s1463_s30 = sphi %s1532_s30, %s2176_s30   ;;  %s1459_s29 = sphi %s1530_s29, %s2164_s29   ;;  %s1455_s28 = sphi %s1528_s28, %s2175_s28   ;;  %s1451_s27 = sphi %s1526_s27, %s2163_s27   ;;  %s1447_s26 = sphi %s1524_s26, %s2174_s26   ;;  %s1443_s25 = sphi %s1522_s25, %s2173_s25   ;;  %s1439_s24 = sphi %s1520_s24, %s2172_s24   ;;  %s1435_s23 = sphi %s1518_s23, %s2171_s23   ;;  %s1431_s22 = sphi %s1516_s22, %s2170_s22   ;;  %s1427_s21 = sphi %s1514_s21, %s2159_s21   ;;  %s1423_s20 = sphi %s1512_s20, %s2169_s20   ;;  %s1419_s19 = sphi %s1510_s19, %s2168_s19   ;;  %s1415_s18 = sphi %s1508_s18, %s2167_s18  }
  0x14   : > { %2107 = sst [smem:[#allocation17_spill]] %s1431_s22  ;;  %s1013_s8 = sadd.s32 4294967294, %s1467_s6  }
  0x15   : > { %2108 = sst [smem:[#allocation18_spill]] %s1447_s26  ;;  %s34_s9 = sadd.s32 1, %s1459_s29 }
  0x16   : > { %2109 = sst [smem:[#allocation19_spill]] %s1451_s27  ;;  %p1584_p0 = scmp.ge.s32.totalorder %s34_s9, 2 }
  0x17   : > { %2110 = sst [smem:[#allocation20_spill]] %s1455_s28  ;;  %p2094_p1 = scmp.eq.s32.totalorder %s1467_s6, 0 }
  0x18   : > { %2111 = sst [smem:[#allocation21_spill]] %s1459_s29  ;;  %p2095_p2 = scmp.eq.s32.totalorder %s1579_s7, 0 }
  0x19   : > { %s2178_s9 = smov (%p1584_p0, %s34_s9), 0  ;;  %p89_p3 = scmp.ne.s32.totalorder %s1435_s23, %s1431_s22 }
  0x1a   : > { %2113 = sst [smem:[#allocation22_spill]] %s2178_s9  ;;  %p95_p4 = scmp.ne.s32.totalorder %s1431_s22, %s1427_s21 }
  0x1b   : > { %p199_p5 = scmp.eq.s32.totalorder %s1579_s7, 3  ;;  %p1604_p6 = por %p89_p3, %p2094_p1 }
  0x1c   : > { %p1610_p7 = por %p95_p4, %p2095_p2  ;;  %p205_p9 = scmp.eq.s32.totalorder %s1013_s8, 3 }
  0x1d   : > { %p1614_p8 = por %p199_p5, %p89_p3  ;;  %p2093_p11 = scmp.lt.s32.totalorder %s1467_s6, 4 }
  0x1e   : > { %s2115_s15 = scalar_select %p1610_p7, 1, 0 }
  0x1f   : > { %s2117_s16 = scalar_select %p1614_p8, 1, 0 }
  0x20   : > { %2116 = sst [smem:[#allocation23_spill]] %s2115_s15  ;;  %p1618_p10 = por %p205_p9, %p95_p4 }
  0x21   : > { %2118 = sst [smem:[#allocation24_spill]] %s2117_s16  ;;  %s266_s12 = sand.u32 1, %s1467_s6  }
  0x22   : > { %s2119_s17 = scalar_select %p1618_p10, 1, 0 }
  0x23   : > { %s268_s13 = sand.u32 1, %s1435_s23   ;;  %s1030_s21 = sshll.u32 %s1459_s29, 2 }
  0x24   : > { %2120 = sst [smem:[#allocation25_spill]] %s2119_s17  ;;  %s1029_s10 = sshll.u32 %s268_s13, 5 }
  0x25   : > { %s1031_s5 = sshll.u32 %s1463_s30, 3  ;;  %s270_s28 = scalar_lea.vmem [#allocation5], %s1029_s10 }
  0x26   : > { %s280_s4 = sshll.u32 %s270_s28, 4  ;;  %s276_s27 = sadd.s32 %s1031_s5, %s1030_s21  ;;  %s281_s4 = int_to_ptr.vmem [resolvable:$true] %s280_s4 }
  0x27   : > { %s1032_s15 = sshll.u32 %s276_s27, 7  ;;  %p1631_p12 = pnand %p2093_p11, %p1604_p6 }
  0x28   : > { %s2122_s1 = sld [smem:[#allocation29_spill]]  ;;  %s1638_s2 = scalar_lea.sflag [#allocation6], %s266_s12 }
  0x29   : > { %p1203_p13 = pneg %p1631_p12  ;;  %s1214_s10 = scalar_lea.vmem %s281_s4, 512 }
  0x2a   : > { %p1215_p3 = scmp.ne.s32.totalorder %s281_s4, %s1214_s10  ;;  %s1469_s5 = smov [#allocation5]  }
  0x2b   : > { %s1219_s21 = sshll.u32 %s1469_s5, 4  ;;  %s1220_s21 = int_to_ptr.vmem [resolvable:$false] %s1219_s21 }
  0x2c   : > { %p1217_p4 = pnand %p1215_p3, %p1203_p13  ;;  %s1221_s27 = scalar_lea.vmem %s1220_s21, 1024 }
  0x2d   : > { %p1222_p6 = scmp.lt.s32.totalorder %s281_s4, %s1220_s21  ;;  %p1223_p9 = scmp.lt.s32.totalorder %s1221_s27, %s1214_s10 }
  0x2e   : > { %s278_s17 = scalar_lea.hbm %s2122_s1, %s1032_s15  ;;  %p1218_p5 = pneg %p1217_p4 }
  0x2f   : > { %p1224_p11 = por %p1223_p9, %p1222_p6 }
  0x31   : > { %p1225_p1 = pnand %p1224_p11, %p1218_p5 }
  0x33   : > { %1228 = shalt.err (!%p1225_p1)
}
  0x34   : > { %1072 = dma.hbm_to_vmem [thread:$0]  (!%p1631_p12), %s278_s17, 512, %s281_s4, %s1638_s2  }
  0x35   : > { %p1020_p2 = scmp.ge.s32.totalorder %s1467_s6, 1  ;;  %p212_p13 = scmp.lt.s32.totalorder %s1467_s6, 5 }
  0x36   : > { %s1470_s28 = smov [#allocation8]   ;;  %p2124_p11 = scmp.eq.s32.totalorder %s1579_s7, 0 }
  0x37   : > { %p1647_p3 = pnand %p1020_p2, %p212_p13  ;;  %s224_s12 = sshll.u32 %s1470_s28, 4  ;;  %s225_s12 = int_to_ptr.vmem [resolvable:$true] %s224_s12 }
  0x38   : > { %s1014_s14 = sshll.u32 %s1459_s29, 3  ;;  %s1240_s4 = scalar_lea.vmem %s225_s12, 1024 }
  0x39   : > { %p1062_p1 = pneg %p1647_p3  ;;  %p1241_p2 = scmp.ne.s32.totalorder %s225_s12, %s1240_s4 }
  0x3a   : > { %p1248_p9 = scmp.lt.s32.totalorder %s225_s12, %s225_s12  ;;  %p1249_p13 = scmp.lt.s32.totalorder %s1240_s4, %s1240_s4 }
  0x3b   : > { %p1655_p4 = pnand %p1062_p1, %p2124_p11 }
  0x3c   : > { %p1250_p10 = por %p1249_p13, %p1248_p9 }
  0x3d   : > { %p1231_p12 = pneg %p1655_p4 }
  0x3f   : > { %p1243_p5 = pnand %p1241_p2, %p1231_p12 }
  0x41   : > { %p1244_p6 = pneg %p1243_p5 }
  0x43   : > { %p1251_p8 = pnand %p1250_p10, %p1244_p6 }
  0x45   : > { %1254 = shalt.err (!%p1251_p8)
}
  0x46   : > { %s1471_s15 = smov 512   ;;  %s1472_s16 = smov 32  }
  0x47   : > { %s2126_s3 = sld [smem:[#allocation31_spill]]  ;;  %s2127_s10 = sadd.s32 1, %s1463_s30 }
  0x48   : > { %s2180_s10 = smov (!%p1584_p0, %s2127_s10), %s1463_s30  ;;  %s1015_s5 = sadd.s32 4294967295, %s1014_s14 }
  0x49   : > { %s1016_s21 = sshll.u32 %s2178_s9, 3  ;;  %p39_p8 = scmp.ge.s32.totalorder %s2180_s10, 2 }
  0x4a   : > { %p43_p10 = scmp.gt.s32.totalorder %s1015_s5, 0  ;;  %s1017_s27 = sadd.s32 4294967295, %s1016_s21 }
  0x4b   : > { %s54_s28 = sadd.s32 1, %s1447_s26  ;;  %s2182_s10 = smov (%p39_p8, %s2180_s10), 0 }
  0x4c   : > { %2128 = sst [smem:[#allocation26_spill]] %s2182_s10  ;;  %s2184_s5 = smov (!%p43_p10, %s1015_s5), 0 }
  0x4d   : > { %1065 = dma.hbm_to_vmem [thread:$0]  (!%p1655_p4), %s2126_s3, 1024, %s225_s12, [#allocation9], %s1471_s15, %s1471_s15, %s1472_s16  }
  0x4e   : > { %p47_p0 = scmp.gt.s32.totalorder %s1017_s27, 0  ;;  %s49_s11 = ssub.s32 %s1463_s30, %s2182_s10 }
  0x4f   : > { %p61_p1 = scmp.ne.s32.totalorder %s1447_s26, %s1443_s25  ;;  %p67_p11 = scmp.ne.s32.totalorder %s1443_s25, %s1439_s24 }
  0x50   : > { %s2186_s27 = smov (!%p47_p0, %s1017_s27), 0  ;;  %p2129_p4 = scmp.eq.s32.totalorder %s1467_s6, 0 }
  0x51   : > { %p2131_p2 = scmp.eq.s32.totalorder %s1579_s7, 0  ;;  %s50_s4 = ssub.s32 %s2184_s5, %s2186_s27 }
  0x52   : > { %p1688_p12 = por %p2129_p4, %p61_p1  ;;  %s2133_s15 = ssub.s32 %s1459_s29, %s2178_s9 }
  0x53   : > { %p1694_p5 = por %p2131_p2, %p67_p11  ;;  %s79_s16 = sor.u32 %s2133_s15, %s49_s11 }
  0x54   : > { %s51_s17 = sor.u32 %s50_s4, %s49_s11  ;;  %p80_p6 = scmp.eq.s32.totalorder %s79_s16, 0 }
  0x55   : > { %p52_p9 = scmp.eq.s32.totalorder %s51_s17, 0  ;;  %s106_s24 = sadd.s32 8, %s1014_s14 }
  0x56   : > { %s2134_s8 = sadd.s32 1, %s1435_s23  ;;  %p107_p13 = scmp.lt.s32.totalorder %s106_s24, 15 }
  0x57   : > { %s1707_s1 = scalar_select %p80_p6, %s1435_s23, %s2134_s8  }
  0x58   : > { %s1710_s3 = scalar_select %p52_p9, %s1447_s26, %s54_s28  }
  0x59   : > { %2135 = sst [smem:[#allocation27_spill]] %s1707_s1  ;;  %s110_s10 = sadd.s32 8, %s1016_s21 }
  0x5a   : > { %2136 = sst [smem:[#allocation28_spill]] %s1710_s3  ;;  %p111_p8 = scmp.lt.s32.totalorder %s110_s10, 15 }
  0x5b   : > { %s241_s27 = sand.u32 1, %s1447_s26   ;;  %s2188_s24 = smov (!%p107_p13, %s106_s24), 15 }
  0x5c   : > { %s2190_s10 = smov (!%p111_p8, %s110_s10), 15  ;;  %s1023_s15 = sshll.u32 %s241_s27, 2 }
  0x5d   : > { %s114_s4 = ssub.s32 %s2188_s24, %s2190_s10  ;;  %s1026_s17 = sshll.u32 %s2184_s5, 2 }
  0x5e   : > { %s1713_s16 = sor.u32 %s114_s4, %s49_s11  ;;  %s1027_s14 = sshll.u32 %s1463_s30, 6 }
  0x5f   : > { %p116_p10 = scmp.eq.s32.totalorder %s1713_s16, 0  ;;  %s255_s8 = sadd.s32 %s1027_s14, %s1026_s17 }
  0x60   : > { %s245_s9 = scalar_lea.vmem [#allocation2], %s1023_s15  ;;  %s1028_s29 = sshll.u32 %s255_s8, 4 }
  0x61   : > { %s259_s28 = sshll.u32 %s245_s9, 4  ;;  %s257_s1 = scalar_lea.hbm %s2077_s0, %s1028_s29  ;;  %s260_s28 = int_to_ptr.vmem [resolvable:$true] %s259_s28 }
  0x62   : > { %p2137_p0 = scmp.lt.s32.totalorder %s1467_s6, 4  ;;  %s1035_s10 = sshll.u32 %s2188_s24, 2 }
  0x63   : > { %s301_s5 = sadd.s32 %s1035_s10, %s1027_s14  ;;  %s242_s11 = scalar_lea.sflag [#allocation3], %s241_s27 }
  0x64   : > { %p1725_p1 = pnand %p2137_p0, %p1688_p12  ;;  %s1268_s15 = scalar_lea.vmem %s260_s28, 64 }
  0x65   : > { %p1269_p4 = scmp.ne.s32.totalorder %s260_s28, %s1268_s15  ;;  %s1473_s9 = smov [#allocation2]  }
  0x66   : > { %p1257_p11 = pneg %p1725_p1  ;;  %s1273_s4 = sshll.u32 %s1473_s9, 4  ;;  %s1274_s4 = int_to_ptr.vmem [resolvable:$false] %s1273_s4 }
  0x67   : > { %s1275_s3 = scalar_lea.vmem %s1274_s4, 128  ;;  %p1276_p9 = scmp.lt.s32.totalorder %s260_s28, %s1274_s4 }
  0x68   : > { %p1271_p2 = pnand %p1269_p4, %p1257_p11  ;;  %p1277_p13 = scmp.lt.s32.totalorder %s1275_s3, %s1268_s15 }
  0x6a   : > { %p1272_p6 = pneg %p1271_p2  ;;  %p1278_p12 = por %p1277_p13, %p1276_p9 }
  0x6c   : > { %p1279_p8 = pnand %p1278_p12, %p1272_p6 }
  0x6e   : > { %1282 = shalt.err (!%p1279_p8)
}
  0x6f   : > { %1069 = dma.hbm_to_vmem [thread:$0]  (!%p1725_p1), %s257_s1, 64, %s260_s28, %s242_s11  }
  0x70   : > { %s118_s29 = sadd.s32 1, %s1423_s20  ;;  %p125_p0 = scmp.ne.s32.totalorder %s1423_s20, %s1419_s19 }
  0x71   : > { %s1737_s12 = scalar_select %p116_p10, %s1423_s20, %s118_s29  }
  0x72   : > { %p131_p11 = scmp.ne.s32.totalorder %s1419_s19, %s1415_s18  ;;  %s289_s24 = sand.u32 1, %s1423_s20  }
  0x73   : > { %s1037_s26 = sshll.u32 %s301_s5, 4  ;;  %p2139_p4 = scmp.eq.s32.totalorder %s1467_s6, 0 }
  0x74   : > { %p2140_p6 = scmp.eq.s32.totalorder %s1579_s7, 0  ;;  %s1033_s17 = sshll.u32 %s289_s24, 2 }
  0x75   : > { %p127_p2 = por %p125_p0, %p2139_p4  ;;  %s2142_s21 = sld [smem:[#allocation30_spill]] }
  0x76   : > { %p1748_p9 = por %p131_p11, %p2140_p6  ;;  %p2143_p1 = scmp.lt.s32.totalorder %s1467_s6, 4 }
  0x77   : > { %s291_s18 = scalar_lea.vmem [#allocation7], %s1033_s17  ;;  %s1474_s5 = smov [#allocation7]  }
  0x78   : > { %p1757_p13 = pnand %p2143_p1, %p127_p2  ;;  %s305_s28 = sshll.u32 %s291_s18, 4  ;;  %s306_s28 = int_to_ptr.vmem [resolvable:$true] %s305_s28 }
  0x79   : > { %s1296_s10 = scalar_lea.vmem %s306_s28, 64  ;;  %s1301_s11 = sshll.u32 %s1474_s5, 4  ;;  %s1302_s11 = int_to_ptr.vmem [resolvable:$false] %s1301_s11 }
  0x7a   : > { %p1285_p10 = pneg %p1757_p13  ;;  %p1297_p12 = scmp.ne.s32.totalorder %s306_s28, %s1296_s10 }
  0x7b   : > { %s303_s1 = scalar_lea.hbm %s2142_s21, %s1037_s26  ;;  %s1303_s15 = scalar_lea.vmem %s1302_s11, 128 }
  0x7c   : > { %p1299_p8 = pnand %p1297_p12, %p1285_p10  ;;  %p1304_p11 = scmp.lt.s32.totalorder %s306_s28, %s1302_s11 }
  0x7d   : > { %p1305_p4 = scmp.lt.s32.totalorder %s1303_s15, %s1296_s10 }
  0x7e   : > { %p1300_p0 = pneg %p1299_p8 }
  0x7f   : > { %p1306_p2 = por %p1305_p4, %p1304_p11 }
  0x81   : > { %p1307_p6 = pnand %p1306_p2, %p1300_p0 }
  0x83   : > { %1310 = shalt.err (!%p1307_p6)
}
  0x84   : > { %1075 = dma.hbm_to_vmem [thread:$0]  (!%p1757_p13), %s303_s1, 64, %s306_s28, %s1638_s2  }
  0x85   : > { %314 = sbr.rel (%p1647_p3) target bundleno = 344 (0x158), region = 40  ;;  %s316_s9 = sand.u32 (!%p1647_p3), 1, %s1443_s25  }
  0x86   : > { %s1769_s4 = sshll.u32 (!%p1647_p3), %s316_s9, 2  ;;  %s317_s3 = scalar_lea.sflag (!%p1647_p3), [#allocation3], %s316_s9 }
  0x87   : > { %s320_s29 = scalar_lea.vmem (!%p1647_p3), [#allocation2], %s1769_s4 }
  0x8a   : > { %1394 = dma.done.wait (%p1694_p5), %s317_s3, 64  }
  0x8b   : > { %1396 = vsyncadd (%p1694_p5), %s317_s3, 4294967232  ;;  %s2145_s24 = sld [smem:[#allocation17_spill]]  ;;  %s325_s26 = sand.u32 1, %s1579_s7  }
  0x8c   : > { %s326_s14 = scalar_lea.sflag [#allocation6], %s325_s26 }
  0x91   : > { %s327_s22 = sand.u32 1, %s2145_s24  }
  0x92   : > { %s1780_s17 = sshll.u32 %s327_s22, 5 }
  0x93   : > { %s1783_s8 = scalar_lea.vmem [#allocation5], %s1780_s17 }
  0x94   : > { %1398 = dma.done.wait (%p1610_p7), %s326_s14, 512  }
  0x95   : > { %1400 = vsyncadd (%p1610_p7), %s326_s14, 4294966784  ;;  %s336_s13 = sand.u32 1, %s1419_s19  }
  0x96   : > { %s1790_s21 = sshll.u32 %s336_s13, 2 }
  0x97   : > { %s338_s1 = scalar_lea.vmem [#allocation7], %s1790_s21 }
  0x98   : > { %1402 = dma.done.wait (%p1748_p9), %s326_s14, 64  }
  0x99   : > { %1404 = vsyncadd (%p1748_p9), %s326_s14, 4294967232  ;;  %p2147_p3 = scmp.eq.s32.totalorder %s1579_s7, 0 }
  0x9b   : > { %1406 = dma.done.wait (%p2147_p3), [#allocation9], 1024   ;;  %p2148_p5 = pmov %p2147_p3 }
  0x9c   : > { %s2149_s16 = sld [smem:[#allocation19_spill]]  ;;  %v403_v0 = vlaneseq  ;;  %v1811_v4 = vld [vmem:[%s1783_s8 + $0x8] sm:$0xff]  ;;  %v1814_v5 = vld [vmem:[%s1783_s8] sm:$0xff]  ;;  %v1817_v6 = vld [vmem:[%s1783_s8 + $0x18] sm:$0xff]  ;;  %s1475_s7 = smov 32  }
  0x9d   : > { %1408 = vsyncadd (%p2148_p5), [#allocation9], 4294966272  ;;  %631 = vrot.lane.b32.xlu1 %v1811_v4, %s1475_s7  ;;  %629 = vrot.lane.b32.xlu0 %v1814_v5, %s1475_s7  ;;  %v1833_v11 = vld [vmem:[%s1783_s8 + $0x10] sm:$0xff]  ;;  %v397_v12 = vld [vmem:[%s320_s29] sm:$0xf]  ;;  %s2150_s15 = sld [smem:[#allocation32_spill]] }
  0x9e   : > { %v1804_v1 = vshrl.u32 %v403_v0, 7  ;;  %v471_v13 = vld [vmem:[#allocation8 + $0x4] ss:$8 sm:$0xf]  ;;  %v408_v15 = vrot.slane %v1833_v11, 7  ;;  %v406_v22 = vrot.slane %v1814_v5, 7 }
  0x9f   : > { %v523_v18 = vld [vmem:[#allocation8 + $0x1] ss:$8 sm:$0xf]  ;;  %v409_v29 = vrot.slane %v1817_v6, 7  ;;  %v407_v42 = vrot.slane %v1811_v4, 7  ;;  %v439_v49 = vrot.slane %v1811_v4, 1 }
  0xa0   : > { %vm405_vm0 = vcmp.eq.s32.totalorder %v1804_v1, 0  ;;  %v1808_v3 = vsub.s32 0, %v1804_v1  ;;  %v1820_v7 = vsub.s32 1, %v1804_v1  ;;  %v1823_v8 = vsub.s32 2, %v1804_v1  ;;  %v400_v44 = vld [vmem:[%s338_s1] sm:$0xf] }
  0xa1   : > { %v1826_v9 = vsub.s32 3, %v1804_v1  ;;  %vm437_vm1 = vcmp.eq.s32.totalorder %v1804_v1, 7  ;;  %635 = vrot.lane.b32.xlu1 %v1817_v6, %s1475_s7  ;;  %633 = vrot.lane.b32.xlu0 %v1833_v11, %s1475_s7  ;;  %v554_v45 = vld [vmem:[#allocation8 + $0x7] ss:$8 sm:$0xf]  ;;  %v438_v59 = vrot.slane %v1814_v5, 1 }
  0xa2   : > { %p391_p7 = scmp.gt.s32.totalorder %s2149_s16, 0  ;;  %p394_p1 = scmp.lt.s32.totalorder %s2149_s16, 1  ;;  %v484_v17 = vrot.slane %v471_v13, %v1823_v8  ;;  %v476_v19 = vrot.slane %v471_v13, %v1808_v3  ;;  %v536_v21 = vrot.slane %v523_v18, %v1823_v8  ;;  %v528_v28 = vrot.slane %v523_v18, %v1808_v3 }
  0xa3   : > { %v469_v16 = vld [vmem:[%s2150_s15] sm:$0xf]  ;;  %v488_v31 = vrot.slane %v471_v13, %v1826_v9  ;;  %v540_v41 = vrot.slane %v523_v18, %v1826_v9  ;;  %v480_v48 = vrot.slane %v471_v13, %v1820_v7  ;;  %v532_v55 = vrot.slane %v523_v18, %v1820_v7  ;;  %s1476_s9 = smov 96   ;;  %s2151_s4 = sld [smem:[#allocation20_spill]] }
  0xa4   : > { %s392_s18 = scalar_select %p391_p7, 1, 0  ;;  %v509_v20 = vrot.slane %v469_v16, %v1823_v8  ;;  %v501_v23 = vrot.slane %v469_v16, %v1808_v3  ;;  %v495_v25 = vmul.f32 %v484_v17, %v1833_v11  ;;  %v493_v27 = vmul.f32 %v476_v19, %v1814_v5 }
  0xa5   : > { %s395_s27 = scalar_select %p394_p1, 1, 0  ;;  %v496_v39 = vmul.f32 %v488_v31, %v1817_v6  ;;  %v513_v40 = vrot.slane %v469_v16, %v1826_v9  ;;  %v505_v53 = vrot.slane %v469_v16, %v1820_v7  ;;  %v494_v54 = vmul.f32 %v480_v48, %v1811_v4 }
  0xa6   : > { %s393_s28 = scvt.s32.f32 %s392_s18  ;;  %v520_v33 = vadd.f32 %v509_v20, %v495_v25  ;;  %v518_v35 = vadd.f32 %v501_v23, %v493_v27  ;;  %v563_v57 = vrot.slane %v554_v45, %v1820_v7  ;;  %v559_v60 = vrot.slane %v554_v45, %v1808_v3  ;;  %s1045_s3 = sshll.u32 %s2149_s16, 2 }
  0xa7   : > { %s396_s10 = scvt.s32.f32 %s395_s27  ;;  %v521_v50 = vadd.f32 %v513_v40, %v496_v39  ;;  %v441_v61 = vrot.slane %v1817_v6, 1  ;;  %v519_v62 = vadd.f32 %v505_v53, %v494_v54  ;;  %v567_v18 = vrot.slane %v554_v45, %v1823_v8  ;;  %s378_s14 = scalar_lea.vmem [#allocation10], %s1780_s17 }
  0xa8   : > { %v398_v2 = vstv %s393_s28  ;;  %v1917_v1 = vand.u32 127, %v403_v0  ;;  %s866_s8 = sshll.u32 %s378_s14, 4  ;;  %s2152_s13 = sld [smem:[#allocation24_spill]]  ;;  %s2001_s8 = int_to_ptr.vmem [resolvable:$true] %s866_s8 }
  0xa9   : > { %v401_v10 = vstv %s396_s10  ;;  %v399_v14 = vmul.f32 %v398_v2, %v397_v12  ;;  %v440_v12 = vrot.slane %v1833_v11, 1  ;;  %s1046_s29 = sshll.u32 %s2151_s4, 3  ;;  %s2153_s16 = sld [smem:[#allocation33_spill]] }
  0xaa   : > { %v402_v56 = vmul.f32 %v401_v10, %v400_v44  ;;  %vm594_vm2 = vcmp.lt.s32.totalorder %v1917_v1, 32  ;;  %vm723_vm3 = vcmp.lt.s32.totalorder %v1917_v1, 96  ;;  %s862_s2 = sadd.s32 %s1046_s29, %s1045_s3  ;;  %s850_s17 = scalar_lea.sflag [#allocation4], %s327_s22 }
  0xab   : > { %v424_v24 = vrot.slane %v399_v14, %v1823_v8  ;;  %v416_v26 = vrot.slane %v399_v14, %v1808_v3  ;;  %v428_v30 = vrot.slane %v399_v14, %v1826_v9  ;;  %v420_v43 = vrot.slane %v399_v14, %v1820_v7  ;;  %s1047_s26 = sshll.u32 %s862_s2, 7  ;;  %s1311_s27 = scalar_lea.vmem %s2001_s8, 512 }
  0xac   : > { %v452_v2 = vrot.slane %v402_v56, %v1820_v7  ;;  %v448_v10 = vrot.slane %v402_v56, %v1808_v3  ;;  %v460_v13 = vrot.slane %v402_v56, %v1826_v9  ;;  %v571_v14 = vrot.slane %v554_v45, %v1826_v9  ;;  %v685_v45 = vld [vmem:[#allocation8 + $0x6] ss:$8 sm:$0xf]  ;;  %p1312_p9 = scmp.ne.s32.totalorder %s2001_s8, %s1311_s27  ;;  %s1477_s28 = smov [#allocation10]  }
  0xad   : > { %v1862_v32 = vsel %vm405_vm0, %v424_v24, %v408_v15  ;;  %v433_v34 = vsel %vm405_vm0, %v416_v26, %v406_v22  ;;  %v436_v38 = vsel %vm405_vm0, %v428_v30, %v409_v29  ;;  %v434_v52 = vsel %vm405_vm0, %v420_v43, %v407_v42  ;;  %v642_v30 = vld [vmem:[#allocation8 + $0x3] ss:$8 sm:$0xf]  ;;  %v599_v42 = vld [vmem:[#allocation8] ss:$8 sm:$0xf] }
  0xae   : > { %v547_v36 = vmul.f32 %v536_v21, %v1862_v32  ;;  %v545_v37 = vmul.f32 %v528_v28, %v433_v34  ;;  %588 = vrot.lane.b32.xlu1 %v1862_v32, %s1475_s7  ;;  %584 = vrot.lane.b32.xlu0 %v433_v34, %s1475_s7  ;;  %v548_v51 = vmul.f32 %v540_v41, %v436_v38  ;;  %p2154_p13 = scmp.ne.s32.totalorder %s2152_s13, 0  ;;  %s1315_s10 = sshll.u32 %s1477_s28, 4  ;;  %s1316_s10 = int_to_ptr.vmem [resolvable:$false] %s1315_s10 }
  0xaf   : > { %v546_v63 = vmul.f32 %v532_v55, %v434_v52  ;;  %v456_v15 = vrot.slane %v402_v56, %v1823_v8  ;;  %v466_v17 = vsel %vm437_vm1, %v452_v2, %v439_v49  ;;  %v465_v20 = vsel %vm437_vm1, %v448_v10, %v438_v59  ;;  %s1999_s18 = scalar_lea.hbm %s2153_s16, %s1047_s26  ;;  %p1318_p8 = scmp.lt.s32.totalorder %s2001_s8, %s1316_s10 }
  0xb0   : > { %v551_v46 = vadd.f32 %v547_v36, %v520_v33  ;;  %v549_v47 = vadd.f32 %v545_v37, %v518_v35  ;;  %v552_v58 = vadd.f32 %v548_v51, %v521_v50  ;;  %v577_v19 = vmul.f32 %v563_v57, %v466_v17  ;;  %p1313_p10 = pnand %p1312_p9, %p2154_p13 }
  0xb1   : > { %v550_v16 = vadd.f32 %v546_v63, %v519_v62  ;;  %v468_v21 = vsel %vm437_vm1, %v460_v13, %v441_v61  ;;  %v467_v22 = vsel %vm437_vm1, %v456_v15, %v440_v12  ;;  %v576_v23 = vmul.f32 %v559_v60, %v465_v20 }
  0xb2   : > { %590 = vrot.lane.b32.xlu1 %v436_v38, %s1475_s7  ;;  %586 = vrot.lane.b32.xlu0 %v434_v52, %s1475_s7  ;;  %v579_v24 = vmul.f32 %v571_v14, %v468_v21  ;;  %v578_v25 = vmul.f32 %v567_v18, %v467_v22  ;;  %v651_v31 = vrot.slane %v642_v30, %v1820_v7  ;;  %p1314_p12 = pneg %p1313_p10 }
  0xb3   : > { %v581_v26 = vadd.f32 %v577_v19, %v550_v16  ;;  %v580_v27 = vadd.f32 %v576_v23, %v549_v47  ;;  %v655_v33 = vrot.slane %v642_v30, %v1823_v8  ;;  %v616_v47 = vrot.slane %v599_v42, %v1826_v9 }
  0xb4   : > { %v583_v28 = vadd.f32 %v579_v24, %v552_v58  ;;  %v582_v29 = vadd.f32 %v578_v25, %v551_v46  ;;  %v604_v46 = vrot.slane %v599_v42, %v1808_v3  ;;  %v608_v48 = vrot.slane %v599_v42, %v1820_v7 }
  0xb5   : > { %v612_v49 = vrot.slane %v599_v42, %v1823_v8  ;;  %v690_v14 = vrot.slane %v685_v45, %v1808_v3  ;;  %v698_v15 = vrot.slane %v685_v45, %v1823_v8  ;;  %v702_v16 = vrot.slane %v685_v45, %v1826_v9 }
  0xb6   : > { %674 = vrot.lane.b32.xlu1 %v466_v17, %s1475_s7  ;;  %672 = vrot.lane.b32.xlu0 %v465_v20, %s1475_s7 }
  0xba   : > { %678 = vrot.lane.b32.xlu1 %v468_v21, %s1475_s7  ;;  %676 = vrot.lane.b32.xlu0 %v467_v22, %s1475_s7  ;;  %s1317_s7 = scalar_lea.vmem %s1316_s10, 1024 }
  0xbb   : > { %p1319_p0 = scmp.lt.s32.totalorder %s1317_s7, %s1311_s27 }
  0xbd   : > { %p1320_p11 = por %p1319_p0, %p1318_p8 }
  0xbe   : > { %717 = vrot.lane.b32.xlu1 %v434_v52, %s1476_s9  ;;  %715 = vrot.lane.b32.xlu0 %v433_v34, %s1476_s9  ;;  %v659_v34 = vrot.slane %v642_v30, %v1826_v9  ;;  %v694_v52 = vrot.slane %v685_v45, %v1820_v7 }
  0xbf   : > { %p1321_p4 = pnand %p1320_p11, %p1314_p12 }
  0xc2   : > { %721 = vrot.lane.b32.xlu1 %v436_v38, %s1476_s9  ;;  %719 = vrot.lane.b32.xlu0 %v1862_v32, %s1476_s9 }
  0xc6   : > { %761 = vrot.lane.b32.xlu1 %v1811_v4, %s1476_s9  ;;  %759 = vrot.lane.b32.xlu0 %v1814_v5, %s1476_s9 }
  0xca   : > { %765 = vrot.lane.b32.xlu1 %v1817_v6, %s1476_s9  ;;  %763 = vrot.lane.b32.xlu0 %v1833_v11, %s1476_s9  ;;  %v647_v11 = vrot.slane %v642_v30, %v1808_v3 }
  0xce   : > { %804 = vrot.lane.b32.xlu1 %v466_v17, %s1476_s9  ;;  %802 = vrot.lane.b32.xlu0 %v465_v20, %s1476_s9 }
  0xd2   : > { %808 = vrot.lane.b32.xlu1 %v468_v21, %s1476_s9  ;;  %806 = vrot.lane.b32.xlu0 %v467_v22, %s1476_s9  ;;  %v729_v22 = vld [vmem:[#allocation8 + $0x2] ss:$8 sm:$0xf] }
 0x10f   : > { %v632_v32 = vpop.permute.xlu1 %631  ;;  %v630_v4 = vpop.permute.xlu0 %629 }
 0x110   : > { %v639_v5 = vsel %vm594_vm2, %v630_v4, %v632_v32 }
 0x111   : > { %v665_v6 = vmul.f32 %v651_v31, %v639_v5 }
 0x113   : > { %v636_v35 = vpop.permute.xlu1 %635  ;;  %v634_v0 = vpop.permute.xlu0 %633 }
 0x114   : > { %v640_v36 = vsel %vm594_vm2, %v636_v35, %v630_v4  ;;  %v637_v37 = vsel %vm594_vm2, %v634_v0, %v636_v35  ;;  %v638_v38 = vsel %vm594_vm2, %v632_v32, %v634_v0  ;;  %v734_v32 = vrot.slane %v729_v22, %v1808_v3 }
 0x115   : > { %v664_v39 = vmul.f32 %v647_v11, %v640_v36  ;;  %v666_v40 = vmul.f32 %v655_v33, %v638_v38  ;;  %v667_v41 = vmul.f32 %v659_v34, %v637_v37  ;;  %v746_v0 = vrot.slane %v729_v22, %v1826_v9  ;;  %v772_v38 = vld [vmem:[#allocation8 + $0x5] ss:$8 sm:$0xf] }
 0x116   : > { %v738_v36 = vrot.slane %v729_v22, %v1820_v7  ;;  %v742_v37 = vrot.slane %v729_v22, %v1823_v8 }
 0x120   : > { %v589_v43 = vpop.permute.xlu1 %588  ;;  %v585_v44 = vpop.permute.xlu0 %584 }
 0x124   : > { %v591_v50 = vpop.permute.xlu1 %590  ;;  %v587_v51 = vpop.permute.xlu0 %586 }
 0x125   : > { %v595_v53 = vsel %vm594_vm2, %v589_v43, %v591_v50  ;;  %v598_v54 = vsel %vm594_vm2, %v591_v50, %v585_v44  ;;  %v596_v55 = vsel %vm594_vm2, %v587_v51, %v589_v43  ;;  %v597_v56 = vsel %vm594_vm2, %v585_v44, %v587_v51 }
 0x126   : > { %v621_v57 = vmul.f32 %v604_v46, %v598_v54  ;;  %v624_v58 = vmul.f32 %v616_v47, %v595_v53  ;;  %v622_v59 = vmul.f32 %v608_v48, %v597_v56  ;;  %v623_v60 = vmul.f32 %v612_v49, %v596_v55 }
 0x127   : > { %v777_v48 = vrot.slane %v772_v38, %v1808_v3  ;;  %v789_v56 = vrot.slane %v772_v38, %v1826_v9 }
 0x128   : > { %v625_v61 = vadd.f32 %v621_v57, %v580_v27  ;;  %v628_v62 = vadd.f32 %v624_v58, %v583_v28  ;;  %v626_v63 = vadd.f32 %v622_v59, %v581_v26  ;;  %v627_v2 = vadd.f32 %v623_v60, %v582_v29  ;;  %v675_v12 = vpop.permute.xlu1 %674  ;;  %v673_v10 = vpop.permute.xlu0 %672  ;;  %v815_v59 = vld [vmem:[#allocation8 + $0x20] ss:$8 sm:$0xf] }
 0x129   : > { %v682_v13 = vsel %vm594_vm2, %v673_v10, %v675_v12  ;;  %v781_v57 = vrot.slane %v772_v38, %v1820_v7  ;;  %v785_v58 = vrot.slane %v772_v38, %v1823_v8 }
 0x12a   : > { %v669_v17 = vadd.f32 %v665_v6, %v626_v63  ;;  %v708_v18 = vmul.f32 %v694_v52, %v682_v13  ;;  %v668_v19 = vadd.f32 %v664_v39, %v625_v61  ;;  %v670_v20 = vadd.f32 %v666_v40, %v627_v2 }
 0x12b   : > { %v671_v21 = vadd.f32 %v667_v41, %v628_v62 }
 0x12c   : > { %v712_v23 = vadd.f32 %v708_v18, %v669_v17  ;;  %v679_v24 = vpop.permute.xlu1 %678  ;;  %v677_v25 = vpop.permute.xlu0 %676 }
 0x12d   : > { %v683_v26 = vsel %vm594_vm2, %v679_v24, %v673_v10  ;;  %v680_v27 = vsel %vm594_vm2, %v677_v25, %v679_v24  ;;  %v681_v28 = vsel %vm594_vm2, %v675_v12, %v677_v25  ;;  %v824_v24 = vrot.slane %v815_v59, %v1820_v7 }
 0x12e   : > { %v707_v29 = vmul.f32 %v690_v14, %v683_v26  ;;  %v709_v30 = vmul.f32 %v698_v15, %v681_v28  ;;  %v710_v31 = vmul.f32 %v702_v16, %v680_v27  ;;  %v820_v15 = vrot.slane %v815_v59, %v1808_v3 }
 0x12f   : > { %v828_v25 = vrot.slane %v815_v59, %v1823_v8 }
 0x130   : > { %v711_v4 = vadd.f32 %v707_v29, %v668_v19  ;;  %v713_v5 = vadd.f32 %v709_v30, %v670_v20  ;;  %v714_v6 = vadd.f32 %v710_v31, %v671_v21  ;;  %v718_v11 = vpop.permute.xlu1 %717  ;;  %v716_v33 = vpop.permute.xlu0 %715 }
 0x131   : > { %v726_v34 = vsel %vm723_vm3, %v716_v33, %v718_v11 }
 0x132   : > { %v751_v35 = vmul.f32 %v734_v32, %v726_v34 }
 0x134   : > { %v755_v39 = vadd.f32 %v751_v35, %v711_v4  ;;  %v722_v40 = vpop.permute.xlu1 %721  ;;  %v720_v41 = vpop.permute.xlu0 %719 }
 0x135   : > { %v727_v42 = vsel %vm723_vm3, %v722_v40, %v716_v33  ;;  %v724_v43 = vsel %vm723_vm3, %v720_v41, %v722_v40  ;;  %v725_v44 = vsel %vm723_vm3, %v718_v11, %v720_v41 }
 0x136   : > { %v754_v45 = vmul.f32 %v746_v0, %v727_v42  ;;  %v752_v46 = vmul.f32 %v738_v36, %v725_v44  ;;  %v753_v47 = vmul.f32 %v742_v37, %v724_v43 }
 0x138   : > { %v758_v49 = vadd.f32 %v754_v45, %v714_v6  ;;  %v756_v50 = vadd.f32 %v752_v46, %v712_v23  ;;  %v757_v51 = vadd.f32 %v753_v47, %v713_v5  ;;  %v762_v52 = vpop.permute.xlu1 %761  ;;  %v760_v53 = vpop.permute.xlu0 %759  ;;  %v832_v23 = vrot.slane %v815_v59, %v1826_v9 }
 0x139   : > { %v769_v54 = vsel %vm723_vm3, %v760_v53, %v762_v52 }
 0x13a   : > { %v794_v55 = vmul.f32 %v777_v48, %v769_v54 }
 0x13c   : > { %v798_v60 = vadd.f32 %v794_v55, %v755_v39  ;;  %v766_v61 = vpop.permute.xlu1 %765  ;;  %v764_v62 = vpop.permute.xlu0 %763 }
 0x13d   : > { %v770_v63 = vsel %vm723_vm3, %v766_v61, %v760_v53  ;;  %v767_v2 = vsel %vm723_vm3, %v764_v62, %v766_v61  ;;  %v768_v12 = vsel %vm723_vm3, %v762_v52, %v764_v62 }
 0x13e   : > { %v797_v10 = vmul.f32 %v789_v56, %v770_v63  ;;  %v795_v13 = vmul.f32 %v781_v57, %v768_v12  ;;  %v796_v14 = vmul.f32 %v785_v58, %v767_v2 }
 0x140   : > { %v801_v16 = vadd.f32 %v797_v10, %v758_v49  ;;  %v799_v17 = vadd.f32 %v795_v13, %v756_v50  ;;  %v800_v18 = vadd.f32 %v796_v14, %v757_v51  ;;  %v805_v19 = vpop.permute.xlu1 %804  ;;  %v803_v20 = vpop.permute.xlu0 %802 }
 0x141   : > { %v812_v21 = vsel %vm723_vm3, %v803_v20, %v805_v19 }
 0x142   : > { %v837_v22 = vmul.f32 %v820_v15, %v812_v21 }
 0x144   : > { %v841_v3 = vadd.f32 %v837_v22, %v798_v60  ;;  %v809_v26 = vpop.permute.xlu1 %808  ;;  %v807_v27 = vpop.permute.xlu0 %806 }
 0x145   : > { %v813_v28 = vsel %vm723_vm3, %v809_v26, %v803_v20  ;;  %v810_v29 = vsel %vm723_vm3, %v807_v27, %v809_v26  ;;  %v811_v30 = vsel %vm723_vm3, %v805_v19, %v807_v27 }
 0x146   : > { %845 = vst [vmem:[%s378_s14] sm:$0xff] %v841_v3  ;;  %v840_v7 = vmul.f32 %v832_v23, %v813_v28  ;;  %v838_v8 = vmul.f32 %v824_v24, %v811_v30  ;;  %v839_v9 = vmul.f32 %v828_v25, %v810_v29 }
 0x148   : > { %v844_v31 = vadd.f32 %v840_v7, %v801_v16  ;;  %v842_v32 = vadd.f32 %v838_v8, %v799_v17  ;;  %v843_v4 = vadd.f32 %v839_v9, %v800_v18 }
 0x14a   : > { %848 = vst [vmem:[%s378_s14 + $0x18] sm:$0xff] %v844_v31  ;;  %846 = vst [vmem:[%s378_s14 + $0x8] sm:$0xff] %v842_v32 }
 0x14b   : > { %847 = vst [vmem:[%s378_s14 + $0x10] sm:$0xff] %v843_v4 }
 0x14c   : > { %1324 = shalt.err (!%p1321_p4)
}
 0x14d   : > { %s1325_s24 = scalar_lea.hbm %s1999_s18, 512  ;;  %s1329_s11 = scalar_lea.hbm %s2153_s16, 2048 }
 0x14e   : > { %p1326_p2 = scmp.ne.s32.totalorder %s1999_s18, %s1325_s24  ;;  %p1330_p5 = scmp.lt.s32.totalorder %s1999_s18, %s2153_s16 }
 0x14f   : > { %p1331_p7 = scmp.lt.s32.totalorder %s1329_s11, %s1325_s24 }
 0x150   : > { %p1327_p6 = pnand %p1326_p2, %p2154_p13 }
 0x151   : > { %p1332_p1 = por %p1331_p7, %p1330_p5 }
 0x152   : > { %p1328_p3 = pneg %p1327_p6 }
 0x154   : > { %p1333_p9 = pnand %p1332_p1, %p1328_p3 }
 0x156   : > { %1336 = shalt.err (!%p1333_p9)
}
 0x157   : > { %1060 = dma.vmem_to_hbm [thread:$0]  (%p2154_p13), %s2001_s8, 512, %s1999_s18, %s850_s17  }
 0x158 PF: > { %s2155_s4 = sld [smem:[#allocation16_spill]]  ;;  %p1083_p10 = scmp.ge.s32.totalorder %s1467_s6, 2 }
 0x159   : > { %s2156_s3 = sld [smem:[#allocation25_spill]] }
 0x15e   : > { %s878_s29 = sand.u32 1, %s2155_s4  }
 0x15f   : > { %p2157_p12 = scmp.ne.s32.totalorder %s2156_s3, 0  ;;  %s879_s2 = scalar_lea.sflag [#allocation4], %s878_s29 }
 0x161   : > { %p1077_p8 = pnand %p1083_p10, %p2157_p12 }
 0x163   : > { %p1078_p0 = pneg %p1077_p8 }
 0x165   : > { %1410 = dma.done.wait (%p1078_p0), %s879_s2, 512  }
 0x166   : > { %1412 = vsyncadd (%p1078_p0), %s879_s2, 4294966784  ;;  %s25_s6 = sadd.s32 1, %s1467_s6   ;;  %s2159_s21 = sld [smem:[#allocation17_spill]] }
 0x167   : > { %p2030_p11 = scmp.ge.s32.totalorder %s25_s6, 6   ;;  %s2160_s14 = sld [smem:[#allocation27_spill]] }
 0x168   : > { %s2161_s8 = sld [smem:[#allocation18_spill]]  ;;  %s2167_s18 = smov %s1419_s19 }
 0x169   : > { %s2162_s13 = sld [smem:[#allocation28_spill]]  ;;  %s2168_s19 = smov %s1423_s20 }
 0x16a   : > { %s2163_s27 = sld [smem:[#allocation21_spill]]  ;;  %s2169_s20 = smov %s1737_s12 }
 0x16b   : > { %s2164_s29 = sld [smem:[#allocation22_spill]]  ;;  %s2170_s22 = smov %s1435_s23 }
 0x16c   : > { %s2165_s1 = sld [smem:[#allocation26_spill]]  ;;  %s2172_s24 = smov %s1443_s25 }
 0x16d   : > { %s2171_s23 = smov %s2160_s14  ;;  %s2175_s28 = smov %s1463_s30 }
 0x16e   : > { %s2173_s25 = smov %s2161_s8  ;;  %24 = sbr.rel (!%p2030_p11) target bundleno = 19 (0x13), region = 121 }
 0x16f   : > { %s2174_s26 = smov %s2162_s13 }
 0x172   : > { %s2176_s30 = smov %s2165_s1 }
 0x173   :  { %884 = vsyncpa [#allocation3], 1 }
 0x174   :  { %886 = vsyncpa [#allocation3 + $0x1], 1 }
 0x175   :  { %887 = vsyncpa [#allocation6], 1 }
 0x176   :  { %889 = vsyncpa [#allocation6 + $0x1], 1 }
 0x177   :  { %890 = vsyncpa [#allocation9], 1 }
 0x178   :  { %891 = vsyncpa [#allocation4], 1 }
 0x179   :  { %893 = vsyncpa [#allocation4 + $0x1], 1 }

</bundles_post_ra>
